<compile_context>
chip_gen: v7x
topology: tpu7x:2x2x1
jax: 0.10.0
libtpu: 0.0.40
codegen_flags: <defaults>
</compile_context>

<pallas_src>
import functools
import math

import jax
import jax.numpy as jnp
from jax.experimental import pallas as pl
from jax.experimental.pallas import tpu as pltpu

LANES = 128
SUBLANES = 8
UNIT = SUBLANES * LANES      # one (8, 128) tile = 1024 elements
ROW_CHUNK = 64               # leading-dim units per inner accumulation chunk


def _default_num_cores() -> int:
    # 2 TensorCores per chip only on v7x; on single-TC v5e/v6e a 2-way
    # "parallel" leading axis is just a serial split (pure overhead).
    try:
        kind = jax.devices()[0].device_kind.lower()
    except Exception:
        return 1
    return 2 if "v7" in kind else 1


def _top1_loss_kernel(pos_ref, neg_ref, out_ref, *,
                      inner_steps, row_chunk, valid_units):
    """pos/neg blocks: (t8, 8, 128); out block: (1, 8, 128) f32 accumulator.

    The output block index is constant across the inner (reduction) grid
    axis, so it stays VMEM-resident and we accumulate directly into it.
    """
    k = pl.program_id(1)
    blk = pl.program_id(0) * inner_steps + k
    t8 = pos_ref.shape[0]
    n_chunks = t8 // row_chunk

    @pl.when(k == 0)
    def _init():
        out_ref[...] = jnp.zeros_like(out_ref)

    def block_sum(masked):
        def body(c, acc):
            i = pl.multiple_of(c * row_chunk, row_chunk)
            pos = pos_ref[pl.ds(i, row_chunk), :, :]
            neg = neg_ref[pl.ds(i, row_chunk), :, :]
            if pos.dtype != jnp.float32:          # bf16 inputs: upcast in-kernel
                pos = pos.astype(jnp.float32)
                neg = neg.astype(jnp.float32)
            # Elementwise loss terms: VPU (sub/mul/add) + EUP (sigmoid).
            term = jax.nn.sigmoid(neg - pos) + jax.nn.sigmoid(neg * neg)
            if masked:
                # Leading-dim validity mask (per 1024-element unit).  Only the
                # boundary block(s) of the over-covering grid run this path.
                unit = (blk * t8 + i
                        + jax.lax.broadcasted_iota(jnp.int32, (row_chunk, 1, 1), 0))
                term = jnp.where(unit < valid_units, term, 0.0)
            # (row_chunk, 8, 128) -> (8, 128): pure VPU vreg adds.
            return acc + jnp.sum(term, axis=0)

        return jax.lax.fori_loop(
            0, n_chunks, body,
            jnp.zeros((SUBLANES, LANES), jnp.float32),
            unroll=True)

    block_full = (blk + 1) * t8 <= valid_units

    @pl.when(block_full)
    def _full():
        out_ref[0, :, :] += block_sum(masked=False)

    @pl.when(jnp.logical_not(block_full))
    def _boundary():
        out_ref[0, :, :] += block_sum(masked=True)


def top1_loss(pos_score: jax.Array, neg_score: jax.Array, *,
              max_tile_rows: int = 4096, num_cores: int | None = None) -> jax.Array:
    """Pallas TOP1 loss.  pos_score / neg_score: same shape, f32 or bf16."""
    assert pos_score.shape == neg_score.shape, "pos/neg must have the same shape"
    assert pos_score.dtype == neg_score.dtype, "pos/neg must have the same dtype"
    total = math.prod(pos_score.shape)
    assert total > 0

    if num_cores is None:
        num_cores = _default_num_cores()

    # --- flatten to a lane-dense (units, 8, 128) slab -----------------------
    valid_units = -(-total // UNIT)
    n_pad = valid_units * UNIT - total
    flat_pos = pos_score.reshape(-1)
    flat_neg = neg_score.reshape(-1)
    if n_pad:
        # Zero padding only up to the next 1024-element boundary.  Each padded
        # zero contributes exactly sigmoid(0)+sigmoid(0)=1.0, subtracted below.
        # Correctness relies on the pad value being 0.
        # TODO(synk): the pad still copies the flat arrays on non-1024-aligned
        # inputs; removing it entirely needs a manual-DMA tail path.
        flat_pos = jnp.pad(flat_pos, (0, n_pad))
        flat_neg = jnp.pad(flat_neg, (0, n_pad))
    pos3 = flat_pos.reshape(valid_units, SUBLANES, LANES)
    neg3 = flat_neg.reshape(valid_units, SUBLANES, LANES)

    # --- tiling --------------------------------------------------------------
    max_t8 = max(1, max_tile_rows // SUBLANES)
    per_core = -(-valid_units // num_cores)
    t8 = min(max_t8, per_core)
    if t8 >= ROW_CHUNK:
        t8 = (t8 // ROW_CHUNK) * ROW_CHUNK       # keep t8 a multiple of ROW_CHUNK
        row_chunk = ROW_CHUNK
    else:
        row_chunk = t8
    inner_steps = -(-per_core // t8)
    # Grid may over-cover valid_units: boundary blocks mask themselves, fully
    # out-of-range blocks get their input block index clamped (and mask to 0).
    max_blk = -(-valid_units // t8) - 1

    def in_map(p, k):
        return (jnp.minimum(p * inner_steps + k, max_blk), 0, 0)

    kernel = functools.partial(
        _top1_loss_kernel,
        inner_steps=inner_steps,
        row_chunk=row_chunk,
        valid_units=valid_units,
    )

    itemsize = jnp.dtype(pos_score.dtype).itemsize
    block_bytes = t8 * UNIT * itemsize
    # 2 inputs x 2 pipeline buffers + tiny output blocks + headroom.
    vmem_limit = int(4 * block_bytes + num_cores * UNIT * 4 + (2 << 20))

    cost = pl.CostEstimate(
        flops=6 * valid_units * UNIT,
        transcendentals=2 * valid_units * UNIT,
        bytes_accessed=2 * valid_units * UNIT * itemsize + num_cores * UNIT * 4,
    )

    partials = pl.pallas_call(
        kernel,
        out_shape=jax.ShapeDtypeStruct((num_cores, SUBLANES, LANES), jnp.float32),
        grid_spec=pltpu.PrefetchScalarGridSpec(
            num_scalar_prefetch=0,
            grid=(num_cores, inner_steps),
            in_specs=[
                pl.BlockSpec((t8, SUBLANES, LANES), in_map),
                pl.BlockSpec((t8, SUBLANES, LANES), in_map),
            ],
            out_specs=pl.BlockSpec((1, SUBLANES, LANES), lambda p, k: (p, 0, 0)),
        ),
        compiler_params=pltpu.CompilerParams(
            dimension_semantics=("parallel", "arbitrary"),
            vmem_limit_bytes=vmem_limit,
        ),
        cost_estimate=cost,
    )(pos3, neg3)

    # Tiny final reduce of the per-core (8, 128) partials, done by XLA, then
    # remove the contribution of the zero-padded tail (1.0 per padded element).
    loss = jnp.sum(partials)
    if n_pad:
        loss = loss - jnp.float32(n_pad)
    return loss


def top1_loss_ref(pos_score, neg_score):
    return (
        jax.nn.sigmoid(neg_score - pos_score).sum()
        + jax.nn.sigmoid(jnp.square(neg_score)).sum()
    )


if __name__ == "__main__":
    key = jax.random.PRNGKey(0)
    k1, k2, k3, k4, k5, k6 = jax.random.split(key, 6)

    # 1) Small aligned shape: batch of 16 sessions, 128 sampled item scores.
    B, N = 16, 128
    pos_score = jax.random.normal(k1, (B, N), dtype=jnp.float32)
    neg_score = jax.random.normal(k2, (B, N), dtype=jnp.float32)
    loss = jax.block_until_ready(top1_loss(pos_score, neg_score))
    ref = top1_loss_ref(pos_score, neg_score)
    assert jnp.allclose(loss, ref, rtol=1e-5, atol=1e-4), (loss, ref)

    # 2) Tiny ragged shape (exercises the 1024-pad + constant-subtraction path).
    pos_r = jax.random.normal(k3, (5, 100), dtype=jnp.float32)
    neg_r = jax.random.normal(k4, (5, 100), dtype=jnp.float32)
    loss_r = jax.block_until_ready(top1_loss(pos_r, neg_r))
    ref_r = top1_loss_ref(pos_r, neg_r)
    assert jnp.allclose(loss_r, ref_r, rtol=1e-5, atol=1e-4), (loss_r, ref_r)

    # 3) Larger ragged shape (exercises the pl.when-gated boundary-block mask
    #    and the chunked in-kernel accumulation loop).
    pos_b = jax.random.normal(k5, (300, 257), dtype=jnp.float32)
    neg_b = jax.random.normal(k6, (300, 257), dtype=jnp.float32)
    loss_b = jax.block_until_ready(top1_loss(pos_b, neg_b))
    ref_b = top1_loss_ref(pos_b, neg_b)
    assert jnp.allclose(loss_b, ref_b, rtol=1e-5, atol=1e-3), (loss_b, ref_b)

    print("KERNEL_OK")
</pallas_src>

<mosaic_0001>
module attributes {stable_mosaic.version = 11 : i64} {
  func.func @_top1_loss_kernel(%arg0: i32, %arg1: i32, %arg2: memref<2x8x128xf32, #tpu.memory_space<vmem>>, %arg3: memref<2x8x128xf32, #tpu.memory_space<vmem>>, %arg4: memref<1x8x128xf32, #tpu.memory_space<vmem>>) attributes {dimension_semantics = [#tpu.dimension_semantics<parallel>, #tpu.dimension_semantics<arbitrary>], iteration_bounds = array<i64: 1, 1>, scalar_prefetch = 0 : i64, scratch_operands = 0 : i64, tpu.core_type = #tpu.core_type<tc>, window_params = [{transform_indices = @transform_0, window_bounds = array<i64: 2, 8, 128>}, {transform_indices = @transform_1, window_bounds = array<i64: 2, 8, 128>}, {transform_indices = @transform_2, window_bounds = array<i64: 1, 8, 128>}]} {
    %c1_i32 = arith.constant 1 : i32
    %0 = arith.muli %arg0, %c1_i32 : i32
    %1 = arith.addi %0, %arg1 : i32
    %c0_i32 = arith.constant 0 : i32
    %2 = arith.cmpi eq, %arg1, %c0_i32 : i32
    %3 = arith.extui %2 : i1 to i32
    %c0_i32_0 = arith.constant 0 : i32
    %4 = arith.cmpi ne, %3, %c0_i32_0 : i32
    scf.if %4 {
      %cst = arith.constant 0.000000e+00 : f32
      %13 = vector.broadcast %cst : f32 to vector<1x8x128xf32>
      %c0 = arith.constant 0 : index
      %c0_5 = arith.constant 0 : index
      %c0_6 = arith.constant 0 : index
      %14 = vector.load %arg4[%c0, %c0_5, %c0_6] : memref<1x8x128xf32, #tpu.memory_space<vmem>>, vector<1x8x128xf32>
      tpu.vector_store %arg4[%c0, %c0_5, %c0_6], %13 {strides = array<i32>} : memref<1x8x128xf32, #tpu.memory_space<vmem>>, vector<1x8x128xf32>,
    } else {
    }
    %c1_i32_1 = arith.constant 1 : i32
    %5 = arith.addi %1, %c1_i32_1 : i32
    %c2_i32 = arith.constant 2 : i32
    %6 = arith.muli %5, %c2_i32 : i32
    %c2_i32_2 = arith.constant 2 : i32
    %7 = arith.cmpi sle, %6, %c2_i32_2 : i32
    %8 = arith.extui %7 : i1 to i32
    %c0_i32_3 = arith.constant 0 : i32
    %9 = arith.cmpi ne, %8, %c0_i32_3 : i32
    scf.if %9 {
      %c0 = arith.constant 0 : index
      %c0_5 = arith.constant 0 : index
      %c0_6 = arith.constant 0 : index
      %13 = vector.load %arg4[%c0, %c0_5, %c0_6] : memref<1x8x128xf32, #tpu.memory_space<vmem>>, vector<1x8x128xf32>
      %14 = vector.shape_cast %13 : vector<1x8x128xf32> to vector<8x128xf32>
      %cst = arith.constant 0.000000e+00 : f32
      %15 = vector.broadcast %cst : f32 to vector<8x128xf32>
      %c0_i32_7 = arith.constant 0 : i32
      %c2_i32_8 = arith.constant 2 : i32
      %16 = arith.muli %c0_i32_7, %c2_i32_8 : i32
      %17 = tpu.assume_multiple %16, 2 : i32
      %18 = arith.index_cast %17 : i32 to index
      %c0_9 = arith.constant 0 : index
      %c0_10 = arith.constant 0 : index
      %19 = vector.load %arg2[%18, %c0_9, %c0_10] : memref<2x8x128xf32, #tpu.memory_space<vmem>>, vector<2x8x128xf32>
      %20 = arith.index_cast %17 : i32 to index
      %c0_11 = arith.constant 0 : index
      %c0_12 = arith.constant 0 : index
      %21 = vector.load %arg3[%20, %c0_11, %c0_12] : memref<2x8x128xf32, #tpu.memory_space<vmem>>, vector<2x8x128xf32>
      %22 = arith.subf %21, %19 : vector<2x8x128xf32>
      %23 = arith.negf %22 : vector<2x8x128xf32>
      %24 = math.exp %23 : vector<2x8x128xf32>
      %cst_13 = arith.constant 1.000000e+00 : f32
      %25 = vector.broadcast %cst_13 : f32 to vector<2x8x128xf32>
      %26 = arith.addf %25, %24 : vector<2x8x128xf32>
      %27 = arith.divf %25, %26 : vector<2x8x128xf32>
      %28 = arith.mulf %21, %21 : vector<2x8x128xf32>
      %29 = arith.negf %28 : vector<2x8x128xf32>
      %30 = math.exp %29 : vector<2x8x128xf32>
      %cst_14 = arith.constant 1.000000e+00 : f32
      %31 = vector.broadcast %cst_14 : f32 to vector<2x8x128xf32>
      %32 = arith.addf %31, %30 : vector<2x8x128xf32>
      %33 = arith.divf %31, %32 : vector<2x8x128xf32>
      %34 = arith.addf %27, %33 : vector<2x8x128xf32>
      %cst_15 = arith.constant dense<0.000000e+00> : vector<8x128xf32>
      %35 = vector.multi_reduction <add>, %34, %cst_15 [0] : vector<2x8x128xf32> to vector<8x128xf32>
      %36 = arith.addf %15, %35 : vector<8x128xf32>
      %c1_i32_16 = arith.constant 1 : i32
      %37 = arith.addf %14, %36 : vector<8x128xf32>
      %c0_17 = arith.constant 0 : index
      %c0_18 = arith.constant 0 : index
      %c0_19 = arith.constant 0 : index
      %38 = vector.load %arg4[%c0_17, %c0_18, %c0_19] : memref<1x8x128xf32, #tpu.memory_space<vmem>>, vector<1x8x128xf32>
      %39 = vector.shape_cast %38 : vector<1x8x128xf32> to vector<8x128xf32>
      %40 = vector.shape_cast %37 : vector<8x128xf32> to vector<1x8x128xf32>
      tpu.vector_store %arg4[%c0_17, %c0_18, %c0_19], %40 {strides = array<i32>} : memref<1x8x128xf32, #tpu.memory_space<vmem>>, vector<1x8x128xf32>,
    } else {
    }
    %true = arith.constant true
    %10 = arith.xori %7, %true : i1
    %11 = arith.extui %10 : i1 to i32
    %c0_i32_4 = arith.constant 0 : i32
    %12 = arith.cmpi ne, %11, %c0_i32_4 : i32
    scf.if %12 {
      %c0 = arith.constant 0 : index
      %c0_5 = arith.constant 0 : index
      %c0_6 = arith.constant 0 : index
      %13 = vector.load %arg4[%c0, %c0_5, %c0_6] : memref<1x8x128xf32, #tpu.memory_space<vmem>>, vector<1x8x128xf32>
      %14 = vector.shape_cast %13 : vector<1x8x128xf32> to vector<8x128xf32>
      %cst = arith.constant 0.000000e+00 : f32
      %15 = vector.broadcast %cst : f32 to vector<8x128xf32>
      %c0_i32_7 = arith.constant 0 : i32
      %c2_i32_8 = arith.constant 2 : i32
      %16 = arith.muli %c0_i32_7, %c2_i32_8 : i32
      %17 = tpu.assume_multiple %16, 2 : i32
      %18 = arith.index_cast %17 : i32 to index
      %c0_9 = arith.constant 0 : index
      %c0_10 = arith.constant 0 : index
      %19 = vector.load %arg2[%18, %c0_9, %c0_10] : memref<2x8x128xf32, #tpu.memory_space<vmem>>, vector<2x8x128xf32>
      %20 = arith.index_cast %17 : i32 to index
      %c0_11 = arith.constant 0 : index
      %c0_12 = arith.constant 0 : index
      %21 = vector.load %arg3[%20, %c0_11, %c0_12] : memref<2x8x128xf32, #tpu.memory_space<vmem>>, vector<2x8x128xf32>
      %22 = arith.subf %21, %19 : vector<2x8x128xf32>
      %23 = arith.negf %22 : vector<2x8x128xf32>
      %24 = math.exp %23 : vector<2x8x128xf32>
      %cst_13 = arith.constant 1.000000e+00 : f32
      %25 = vector.broadcast %cst_13 : f32 to vector<2x8x128xf32>
      %26 = arith.addf %25, %24 : vector<2x8x128xf32>
      %27 = arith.divf %25, %26 : vector<2x8x128xf32>
      %28 = arith.mulf %21, %21 : vector<2x8x128xf32>
      %29 = arith.negf %28 : vector<2x8x128xf32>
      %30 = math.exp %29 : vector<2x8x128xf32>
      %cst_14 = arith.constant 1.000000e+00 : f32
      %31 = vector.broadcast %cst_14 : f32 to vector<2x8x128xf32>
      %32 = arith.addf %31, %30 : vector<2x8x128xf32>
      %33 = arith.divf %31, %32 : vector<2x8x128xf32>
      %34 = arith.addf %27, %33 : vector<2x8x128xf32>
      %c2_i32_15 = arith.constant 2 : i32
      %35 = arith.muli %1, %c2_i32_15 : i32
      %36 = arith.addi %35, %17 : i32
      %37 = tpu.iota {dimensions = array<i32: 0>} : vector<2x1x1xi32>
      %38 = vector.broadcast %36 : i32 to vector<2x1x1xi32>
      %39 = arith.addi %38, %37 : vector<2x1x1xi32>
      %c2_i32_16 = arith.constant 2 : i32
      %40 = vector.broadcast %c2_i32_16 : i32 to vector<2x1x1xi32>
      %41 = arith.cmpi slt, %39, %40 : vector<2x1x1xi32>
      %cst_17 = arith.constant 0.000000e+00 : f32
      %42 = vector.shape_cast %41 : vector<2x1x1xi1> to vector<2x1x1xi1>
      %43 = vector.broadcast %42 : vector<2x1x1xi1> to vector<2x8x128xi1>
      %44 = vector.broadcast %cst_17 : f32 to vector<2x8x128xf32>
      %45 = arith.select %43, %34, %44 : vector<2x8x128xi1>, vector<2x8x128xf32>
      %cst_18 = arith.constant dense<0.000000e+00> : vector<8x128xf32>
      %46 = vector.multi_reduction <add>, %45, %cst_18 [0] : vector<2x8x128xf32> to vector<8x128xf32>
      %47 = arith.addf %15, %46 : vector<8x128xf32>
      %c1_i32_19 = arith.constant 1 : i32
      %48 = arith.addf %14, %47 : vector<8x128xf32>
      %c0_20 = arith.constant 0 : index
      %c0_21 = arith.constant 0 : index
      %c0_22 = arith.constant 0 : index
      %49 = vector.load %arg4[%c0_20, %c0_21, %c0_22] : memref<1x8x128xf32, #tpu.memory_space<vmem>>, vector<1x8x128xf32>
      %50 = vector.shape_cast %49 : vector<1x8x128xf32> to vector<8x128xf32>
      %51 = vector.shape_cast %48 : vector<8x128xf32> to vector<1x8x128xf32>
      tpu.vector_store %arg4[%c0_20, %c0_21, %c0_22], %51 {strides = array<i32>} : memref<1x8x128xf32, #tpu.memory_space<vmem>>, vector<1x8x128xf32>,
    } else {
    }
    return
  }
  func.func @transform_0(%arg0: i32, %arg1: i32) -> (i32, i32, i32) {
    %c1_i32 = arith.constant 1 : i32
    %0 = arith.muli %arg0, %c1_i32 : i32
    %1 = arith.addi %0, %arg1 : i32
    %c0_i32 = arith.constant 0 : i32
    %2 = arith.minsi %1, %c0_i32 : i32
    %c0_i32_0 = arith.constant 0 : i32
    %c0_i32_1 = arith.constant 0 : i32
    %c0_i32_2 = arith.constant 0 : i32
    return %2, %c0_i32_0, %c0_i32_1 : i32, i32, i32
  }
  func.func @transform_1(%arg0: i32, %arg1: i32) -> (i32, i32, i32) {
    %c1_i32 = arith.constant 1 : i32
    %0 = arith.muli %arg0, %c1_i32 : i32
    %1 = arith.addi %0, %arg1 : i32
    %c0_i32 = arith.constant 0 : i32
    %2 = arith.minsi %1, %c0_i32 : i32
    %c0_i32_0 = arith.constant 0 : i32
    %c0_i32_1 = arith.constant 0 : i32
    %c0_i32_2 = arith.constant 0 : i32
    return %2, %c0_i32_0, %c0_i32_1 : i32, i32, i32
  }
  func.func @transform_2(%arg0: i32, %arg1: i32) -> (i32, i32, i32) {
    %c0_i32 = arith.constant 0 : i32
    %c0_i32_0 = arith.constant 0 : i32
    %c0_i32_1 = arith.constant 0 : i32
    return %arg0, %c0_i32, %c0_i32_0 : i32, i32, i32
  }
}

</mosaic_0001>

<bundles_post_ra>
// kernel: tpu_custom_call.1
= control target key start
LH: loop header
LB: loop body
LE: loop exit
PB: predicated region body
PF: predicated region fallthrough
CT: control target
= control target key end

     0   :  { %7 = vsyncpa [#allocation3], 0  ;;  %s350_s0 = inlined_call_operand.hbm [shape: f32[2,8,128], index: 0, kind: input, shape index: {}]   ;;  %s351_s1 = inlined_call_operand.hbm [shape: f32[2,8,128], index: 1, kind: input, shape index: {}]   ;;  %s352_s2 = inlined_call_operand.hbm [shape: f32[1,8,128], index: 2, kind: output, shape index: {}]  }
   0x1   :  { %8 = vsyncpa [#allocation6], 0 }
   0x2   :  { %9 = vsyncpa [#allocation4], 0  ;;  %s294_s9 = smov [#allocation2]   ;;  %s222_s13 = scalar_lea.hbm %s350_s0, 256 }
   0x3   :  { %s21_s10 = sshll.u32 %s294_s9, 4  ;;  %p223_p0 = scmp.ne.s32.totalorder %s350_s0, %s222_s13  ;;  %s22_s10 = int_to_ptr.vmem [resolvable:$true] %s21_s10 }
   0x4   :  { %p226_p1 = scmp.lt.u32.totalorder %s222_s13, %s350_s0 }
   0x6   :  { %p228_p2 = pnand %p226_p1, %p223_p0 }
   0x8   :  { %231 = shalt.err (!%p228_p2)
}
   0x9   :  { %s232_s18 = scalar_lea.vmem %s22_s10, 256  ;;  %p237_p4 = scmp.lt.s32.totalorder %s22_s10, %s22_s10 }
   0xa   :  { %p233_p3 = scmp.ne.s32.totalorder %s22_s10, %s232_s18  ;;  %p238_p5 = scmp.lt.s32.totalorder %s232_s18, %s232_s18 }
   0xc   :  { %p239_p6 = por %p238_p5, %p237_p4 }
   0xe   :  { %p240_p7 = pnand %p239_p6, %p233_p3 }
  0x10   :  { %243 = shalt.err (!%p240_p7)
}
  0x11   :  { %s295_s19 = smov 128   ;;  %s296_s20 = smov 8  }
  0x12   :  { %27 = dma.hbm_to_vmem [thread:$0]  %s350_s0, 256, %s22_s10, [#allocation3], %s295_s19, %s295_s19, %s296_s20  }
  0x13   :  { %s297_s23 = smov [#allocation5]   ;;  %s244_s27 = scalar_lea.hbm %s351_s1, 256 }
  0x14   :  { %s39_s24 = sshll.u32 %s297_s23, 4  ;;  %p245_p8 = scmp.ne.s32.totalorder %s351_s1, %s244_s27  ;;  %s40_s24 = int_to_ptr.vmem [resolvable:$true] %s39_s24 }
  0x15   :  { %p248_p9 = scmp.lt.u32.totalorder %s244_s27, %s351_s1 }
  0x17   :  { %p250_p10 = pnand %p248_p9, %p245_p8 }
  0x19   :  { %253 = shalt.err (!%p250_p10)
}
  0x1a   :  { %s254_s4 = scalar_lea.vmem %s40_s24, 256  ;;  %p259_p12 = scmp.lt.s32.totalorder %s40_s24, %s40_s24 }
  0x1b   :  { %p255_p11 = scmp.ne.s32.totalorder %s40_s24, %s254_s4  ;;  %p260_p13 = scmp.lt.s32.totalorder %s254_s4, %s254_s4 }
  0x1d   :  { %p261_p0 = por %p260_p13, %p259_p12 }
  0x1f   :  { %p262_p1 = pnand %p261_p0, %p255_p11 }
  0x21   :  { %265 = shalt.err (!%p262_p1)
}
  0x22   :  { %45 = dma.hbm_to_vmem [thread:$0]  %s351_s1, 256, %s40_s24, [#allocation6], %s295_s19, %s295_s19, %s296_s20  }
  0x23   :  { %288 = dma.done.wait [#allocation3], 256  }
  0x24   :  { %289 = vsyncadd [#allocation3], 4294967040 }
  0x25   :  { %290 = dma.done.wait [#allocation6], 256  }
  0x26   :  { %291 = vsyncadd [#allocation6], 4294967040  ;;  %v75_v0 = vld [vmem:[#allocation2] sm:$0xff]  ;;  %v76_v1 = vld [vmem:[#allocation2 + $0x8] sm:$0xff]  ;;  %s298_s1 = smov [#allocation7]  }
  0x27   :  { %v78_v2 = vld [vmem:[#allocation5] sm:$0xff]  ;;  %v79_v3 = vld [vmem:[#allocation5 + $0x8] sm:$0xff]  ;;  %s178_s6 = sshll.u32 %s298_s1, 4  ;;  %s179_s6 = int_to_ptr.vmem [resolvable:$true] %s178_s6 }
  0x28   :  { %v80_v4 = vsub.f32 %v78_v2, %v75_v0  ;;  %v94_v5 = vmul.f32 %v78_v2, %v78_v2  ;;  %v81_v6 = vsub.f32 %v79_v3, %v76_v1  ;;  %v95_v7 = vmul.f32 %v79_v3, %v79_v3  ;;  %s266_s7 = scalar_lea.vmem %s179_s6, 128  ;;  %p271_p3 = scmp.lt.s32.totalorder %s179_s6, %s179_s6 }
  0x29   :  { %p267_p2 = scmp.ne.s32.totalorder %s179_s6, %s266_s7  ;;  %p272_p4 = scmp.lt.s32.totalorder %s266_s7, %s266_s7 }
  0x2a   :  { %v192_v8 = vmul.f32 -1.442695, %v80_v4  ;;  %v194_v9 = vmul.f32 -1.442695, %v94_v5  ;;  %v193_v10 = vmul.f32 -1.442695, %v81_v6 }
  0x2b   :  { %v195_v11 = vmul.f32 -1.442695, %v95_v7  ;;  %p273_p5 = por %p272_p4, %p271_p3 }
  0x2c   :  { %206 = vpow2.f32 %v192_v8 }
  0x2d   :  { %208 = vpow2.f32 %v193_v10  ;;  %p274_p6 = pnand %p273_p5, %p267_p2 }
  0x2e   :  { %210 = vpow2.f32 %v194_v9 }
  0x2f   :  { %212 = vpow2.f32 %v195_v11 }
  0x36   :  { %v207_v12 = vpop.eup %206 }
  0x37   :  { %v209_v13 = vpop.eup %208  ;;  %v88_v14 = vadd.f32 1.0, %v207_v12 }
  0x38   :  { %v211_v15 = vpop.eup %210  ;;  %v89_v16 = vadd.f32 1.0, %v209_v13 }
  0x39   :  { %v213_v17 = vpop.eup %212  ;;  %214 = vrcp.f32 %v88_v14  ;;  %v102_v18 = vadd.f32 1.0, %v211_v15 }
  0x3a   :  { %216 = vrcp.f32 %v89_v16  ;;  %v103_v19 = vadd.f32 1.0, %v213_v17 }
  0x3b   :  { %218 = vrcp.f32 %v102_v18 }
  0x3c   :  { %220 = vrcp.f32 %v103_v19 }
  0x43   :  { %v215_v20 = vpop.eup %214 }
  0x44   :  { %v217_v21 = vpop.eup %216 }
  0x45   :  { %v219_v22 = vpop.eup %218 }
  0x46   :  { %v221_v23 = vpop.eup %220  ;;  %v108_v24 = vadd.f32 %v219_v22, %v215_v20 }
  0x47   :  { %v109_v25 = vadd.f32 %v221_v23, %v217_v21 }
  0x49   :  { %v110_v26 = vadd.f32 %v109_v25, %v108_v24 }
  0x4b   :  { %113 = vst [vmem:[#allocation7] sm:$0xff] %v110_v26 }
  0x4c   :  { %277 = shalt.err (!%p274_p6)
}
  0x4d   :  { %s278_s10 = scalar_lea.hbm %s352_s2, 128 }
  0x4e   :  { %p279_p7 = scmp.ne.s32.totalorder %s352_s2, %s278_s10  ;;  %p282_p8 = scmp.lt.u32.totalorder %s278_s10, %s352_s2 }
  0x50   :  { %p284_p9 = pnand %p282_p8, %p279_p7 }
  0x52   :  { %287 = shalt.err (!%p284_p9)
}
  0x53   :  { %181 = dma.vmem_to_hbm [thread:$0]  %s179_s6, 128, %s352_s2, [#allocation4]  }
  0x54   :  { %292 = dma.done.wait [#allocation4], 128  }
  0x55   :  { %293 = vsyncadd [#allocation4], 4294967168 }
  0x56   :  { %185 = vsyncpa [#allocation3], 1 }
  0x57   :  { %186 = vsyncpa [#allocation6], 1 }
  0x58   :  { %187 = vsyncpa [#allocation4], 1 }

</bundles_post_ra>
